<compile_context>
chip_gen: v7x
topology: tpu7x:2x2x1
jax: 0.10.0
libtpu: 0.0.40
codegen_flags: <defaults>
</compile_context>

<pallas_src>
import math
from functools import lru_cache

import jax
import jax.numpy as jnp
from jax import lax
from jax.experimental import pallas as pl
from jax.experimental.pallas import tpu as pltpu

LANE = 128                      # lane width: class-axis padding target
SUBLANE = 8                     # sublane width: row-tile alignment
ROW_TILE_CAP = 8192             # rows per tile cap (budget-guarded below)
DEFAULT_KSPLIT_TILE_F = 512     # feature-tile width for the K-split path
XLA_FASTPATH_BYTES = 256 * 1024  # below this, plain XLA beats pallas launch


def _round_up(x, m):
    return ((x + m - 1) // m) * m


@lru_cache(maxsize=1)
def _vmem_budget_and_limit():
    """Generation-aware VMEM sizing.

    v5e/v6e: 128 MiB VMEM per TensorCore; v7x: 64 MiB. Use ~1/2 of physical
    capacity as the tiling budget and ~3/4 as the scoped-VMEM limit. Falls
    back to v7x-safe numbers if the query is unavailable.
    """
    cap = 64 * 1024 * 1024
    try:
        info = pltpu.get_tpu_info()
        cap = int(getattr(info, "vmem_capacity_bytes", cap)) or cap
    except Exception:
        pass
    return cap // 2, (cap * 3) // 4


# --------------------------------------------------------------------------
# Kernels
# --------------------------------------------------------------------------
def _linear_kernel(x_ref, w_ref, b_ref, o_ref):
    # out_tile = x_tile @ W + b, f32 accumulation on the MXU.
    acc = jnp.dot(x_ref[...], w_ref[...], preferred_element_type=jnp.float32)
    o_ref[...] = (acc + b_ref[...]).astype(o_ref.dtype)


def _make_linear_ksplit_kernel(num_features, tile_f):
    """Kernel for the feature-split (K-split) path with an f32 accumulator."""
    rem = num_features % tile_f  # static: ragged last feature block?

    def kernel(x_ref, w_ref, b_ref, o_ref, acc_ref):
        k = pl.program_id(1)

        @pl.when(k == 0)
        def _():
            acc_ref[...] = jnp.zeros_like(acc_ref)

        x = x_ref[...]
        if rem:
            # The last feature block reads undefined VMEM past column F; zero
            # it so the (zero-padded) weight contraction stays exact.
            col = lax.broadcasted_iota(jnp.int32, x.shape, 1) + k * tile_f
            x = jnp.where(col < num_features, x, jnp.zeros_like(x))

        acc_ref[...] += jnp.dot(x, w_ref[...],
                                preferred_element_type=jnp.float32)

        @pl.when(k == pl.num_programs(1) - 1)
        def _():
            o_ref[...] = (acc_ref[...] + b_ref[...]).astype(o_ref.dtype)

    return kernel


# --------------------------------------------------------------------------
# Parameter canonicalization (hoisted out of the per-call hot path)
# --------------------------------------------------------------------------
def prepare_params(weight, bias, dtype=None):
    """weight: [C, F] (PyTorch nn.Linear layout), bias: [C].

    Returns:
      w_c   [F, C_pad]  pre-transposed; only the class axis is padded to a
                        lane-dense multiple of 128 (feature axis untouched, so
                        the kernel's x DMA reads exactly N*F elements).
      b_pad [1, C_pad]  f32 bias (added to the f32 accumulator).
    """
    C, F = weight.shape
    c_pad = _round_up(C, LANE)
    w_dtype = dtype if dtype is not None else weight.dtype
    w_c = jnp.zeros((F, c_pad), w_dtype).at[:, :C].set(weight.T.astype(w_dtype))
    b_pad = jnp.zeros((1, c_pad), jnp.float32).at[0, :C].set(
        bias.astype(jnp.float32))
    return w_c, b_pad


# --------------------------------------------------------------------------
# Tile sizing
# --------------------------------------------------------------------------
def _apply_row_caps(n, tile):
    cap = ROW_TILE_CAP
    if n >= 128:
        # Ensure >= 2 row tiles so v7x's two TensorCores both get work
        # (neutral on single-TC v5e/v6e).
        cap = min(cap, _round_up(pl.cdiv(n, 2), SUBLANE))
    tile = min(tile, (n // SUBLANE) * SUBLANE, cap)
    return max(SUBLANE, (tile // SUBLANE) * SUBLANE)


def _pick_tile_n(n, f, c_pad, x_isz, w_isz, o_isz, budget):
    """Row tile for the resident-weight path."""
    if n < SUBLANE:
        return n  # full-extent row block (legal: equals the array dim)
    fixed = 2 * f * c_pad * w_isz + 2 * c_pad * 4        # W + bias buffers
    per_row = 2 * (f * x_isz + c_pad * o_isz)            # dbl-buffered x + out
    by_budget = max(SUBLANE, (budget - fixed) // max(per_row, 1))
    return _apply_row_caps(n, by_budget)


def _pick_tile_n_ksplit(n, tf, c_pad, x_isz, w_isz, o_isz, budget):
    """Row tile for the K-split path."""
    if n < SUBLANE:
        return n
    fixed = 2 * tf * c_pad * w_isz + 2 * c_pad * 4       # dbl-buffered W + bias
    per_row = 2 * tf * x_isz + 2 * c_pad * o_isz + c_pad * 4  # x, out, f32 acc
    by_budget = max(SUBLANE, (budget - fixed) // max(per_row, 1))
    return _apply_row_caps(n, by_budget)


# --------------------------------------------------------------------------
# Forward
# --------------------------------------------------------------------------
def _pallas_linear(x, w_c, b_pad, out_dtype, *, force_ksplit, tile_n, tile_f):
    N, F = x.shape
    _, c_pad = w_c.shape
    budget, vmem_limit = _vmem_budget_and_limit()
    x_isz = jnp.dtype(x.dtype).itemsize
    w_isz = jnp.dtype(w_c.dtype).itemsize
    o_isz = jnp.dtype(out_dtype).itemsize

    w_bytes = F * c_pad * w_isz
    use_ksplit = force_ksplit or (w_bytes > budget // 3)

    def clamp_rows(tn):
        if N < SUBLANE:
            return N                                   # full-extent row block
        return max(SUBLANE,
                   (min(tn, (N // SUBLANE) * SUBLANE) // SUBLANE) * SUBLANE)

    if not use_ksplit:
        tn = tile_n if tile_n is not None else _pick_tile_n(
            N, F, c_pad, x_isz, w_isz, o_isz, budget)
        tn = clamp_rows(tn)
        grid = (pl.cdiv(N, tn),)
        return pl.pallas_call(
            _linear_kernel,
            out_shape=jax.ShapeDtypeStruct((N, c_pad), out_dtype),
            grid_spec=pltpu.PrefetchScalarGridSpec(
                num_scalar_prefetch=0,
                grid=grid,
                in_specs=[
                    pl.BlockSpec((tn, F), lambda i: (i, 0)),      # x rows walk
                    pl.BlockSpec((F, c_pad), lambda i: (0, 0)),   # W resident
                    pl.BlockSpec((1, c_pad), lambda i: (0, 0)),   # b resident
                ],
                out_specs=pl.BlockSpec((tn, c_pad), lambda i: (i, 0)),
            ),
            compiler_params=pltpu.CompilerParams(
                dimension_semantics=("parallel",),
                vmem_limit_bytes=vmem_limit,
            ),
        )(x, w_c, b_pad)

    # ---- K-split path: weight too large to keep resident in VMEM. ----
    tf = tile_f if tile_f is not None else DEFAULT_KSPLIT_TILE_F
    tf = _round_up(min(tf, _round_up(F, LANE)), LANE)
    f_pad = _round_up(F, tf)
    if w_c.shape[0] != f_pad:
        # Zero-pad only the (param-sized) weight rows; x stays unpadded and
        # its ragged last feature block is masked inside the kernel.
        # TODO(synk): cache the F-padded weight outside the hot path.
        w_k = jnp.zeros((f_pad, c_pad), w_c.dtype).at[:F, :].set(w_c)
    else:
        w_k = w_c

    tn = tile_n if tile_n is not None else _pick_tile_n_ksplit(
        N, tf, c_pad, x_isz, w_isz, o_isz, budget)
    tn = clamp_rows(tn)
    grid = (pl.cdiv(N, tn), f_pad // tf)
    kernel = _make_linear_ksplit_kernel(F, tf)
    return pl.pallas_call(
        kernel,
        out_shape=jax.ShapeDtypeStruct((N, c_pad), out_dtype),
        grid_spec=pltpu.PrefetchScalarGridSpec(
            num_scalar_prefetch=0,
            grid=grid,
            in_specs=[
                pl.BlockSpec((tn, tf), lambda i, k: (i, k)),      # x tile walk
                pl.BlockSpec((tf, c_pad), lambda i, k: (k, 0)),   # W k-slab
                pl.BlockSpec((1, c_pad), lambda i, k: (0, 0)),    # b resident
            ],
            out_specs=pl.BlockSpec((tn, c_pad), lambda i, k: (i, 0)),
            scratch_shapes=[pltpu.VMEM((tn, c_pad), jnp.float32)],
        ),
        compiler_params=pltpu.CompilerParams(
            dimension_semantics=("parallel", "arbitrary"),
            vmem_limit_bytes=vmem_limit,
        ),
    )(x, w_k, b_pad)


def logistic_regression_forward(x, w_c, b_pad, num_classes, *,
                                return_padded=False, force_pallas=False,
                                force_ksplit=False, tile_n=None, tile_f=None,
                                compute_dtype=None):
    """x: [..., F]; w_c: [F, C_pad]; b_pad: [1, C_pad] -> [..., num_classes]
    (or [..., C_pad] lane-dense padded output if return_padded=True)."""
    orig_dtype = x.dtype
    orig_shape = x.shape
    F, _ = w_c.shape
    if orig_shape[-1] != F:
        raise ValueError(f"x feature dim {orig_shape[-1]} != weight dim {F}")

    x2 = x.reshape(-1, F) if x.ndim != 2 else x
    N = x2.shape[0]

    # Optional reduced-precision compute path (bf16 x/W, f32 accumulate).
    if compute_dtype is not None and x2.dtype != compute_dtype:
        x2 = x2.astype(compute_dtype)
    if x2.dtype != w_c.dtype:
        x2 = x2.astype(w_c.dtype)

    small = N * F * jnp.dtype(x2.dtype).itemsize < XLA_FASTPATH_BYTES
    if small and not (force_pallas or force_ksplit):
        # Tiny problem: pallas_call launch + pipeline setup dwarfs the work.
        out = (jnp.dot(x2, w_c, preferred_element_type=jnp.float32)
               + b_pad).astype(orig_dtype)
    else:
        out = _pallas_linear(x2, w_c, b_pad, orig_dtype,
                             force_ksplit=force_ksplit,
                             tile_n=tile_n, tile_f=tile_f)

    if not return_padded:
        # NOTE: this column slice costs an extra HBM pass over the output;
        # pass return_padded=True (and read [:, :num_classes] lazily or fuse
        # the consumer) when throughput matters.
        out = out[:, :num_classes]
    return out.reshape(orig_shape[:-1] + (out.shape[-1],))


# --------------------------------------------------------------------------
# Parameter init matching the PyTorch module
# --------------------------------------------------------------------------
def init_params(key, num_features, num_classes, dtype=jnp.float32):
    """weight: xavier_uniform_ over [num_classes, num_features];
       bias: PyTorch Linear default U(-1/sqrt(fan_in), 1/sqrt(fan_in))."""
    kw, kb = jax.random.split(key)
    fan_in, fan_out = num_features, num_classes
    bound_w = math.sqrt(6.0 / (fan_in + fan_out))
    weight = jax.random.uniform(
        kw, (num_classes, num_features), dtype, minval=-bound_w, maxval=bound_w)
    bound_b = 1.0 / math.sqrt(fan_in)
    bias = jax.random.uniform(
        kb, (num_classes,), dtype, minval=-bound_b, maxval=bound_b)
    return weight, bias


if __name__ == "__main__":
    key = jax.random.PRNGKey(0)
    k_x, k_p, k_x2, k_p2 = jax.random.split(key, 4)

    # Case 1: resident-weight path, unpadded F, ragged row tiling (grid of 3,
    # last block's OOB rows clipped).
    batch, num_features, num_classes = 20, 32, 16
    x = jax.random.normal(k_x, (batch, num_features), jnp.float32)
    weight, bias = init_params(k_p, num_features, num_classes)
    w_c, b_pad = prepare_params(weight, bias)     # one-time canonicalization
    z = logistic_regression_forward(x, w_c, b_pad, num_classes,
                                    force_pallas=True, tile_n=8)
    jax.block_until_ready(z)
    ref = x @ weight.T + bias
    assert z.shape == (batch, num_classes)
    assert jnp.allclose(z, ref, atol=1e-5, rtol=1e-5)

    # Case 2: K-split accumulator path (forced at small shapes for coverage),
    # ragged last feature block masked in-kernel.
    batch2, nf2, nc2 = 24, 300, 10
    x2 = jax.random.normal(k_x2, (batch2, nf2), jnp.float32)
    w2, b2 = init_params(k_p2, nf2, nc2)
    w2_c, b2_pad = prepare_params(w2, b2)
    z2 = logistic_regression_forward(x2, w2_c, b2_pad, nc2,
                                     force_pallas=True, force_ksplit=True,
                                     tile_f=128)
    jax.block_until_ready(z2)
    ref2 = x2 @ w2.T + b2
    assert z2.shape == (batch2, nc2)
    assert jnp.allclose(z2, ref2, atol=1e-4, rtol=1e-4)

    # Case 3: tiny-problem XLA fast path (no Pallas launch).
    z3 = logistic_regression_forward(x, w_c, b_pad, num_classes)
    jax.block_until_ready(z3)
    assert jnp.allclose(z3, ref, atol=1e-5, rtol=1e-5)

    print("KERNEL_OK")
</pallas_src>

<mosaic_0001>
module attributes {stable_mosaic.version = 11 : i64} {
  func.func @_linear_kernel(%arg0: i32, %arg1: memref<8x32xf32, #tpu.memory_space<vmem>>, %arg2: memref<32x128xf32, #tpu.memory_space<vmem>>, %arg3: memref<1x128xf32, #tpu.memory_space<vmem>>, %arg4: memref<8x128xf32, #tpu.memory_space<vmem>>) attributes {dimension_semantics = [#tpu.dimension_semantics<parallel>], iteration_bounds = array<i64: 3>, scalar_prefetch = 0 : i64, scratch_operands = 0 : i64, tpu.core_type = #tpu.core_type<tc>, window_params = [{transform_indices = @transform_0, window_bounds = array<i64: 8, 32>}, {pipeline_mode = #tpu.pipeline_mode<synchronous>, transform_indices = @transform_1, window_bounds = array<i64: 32, 128>}, {pipeline_mode = #tpu.pipeline_mode<synchronous>, transform_indices = @transform_2, window_bounds = array<i64: 1, 128>}, {transform_indices = @transform_3, window_bounds = array<i64: 8, 128>}]} {
    %c0 = arith.constant 0 : index
    %c0_0 = arith.constant 0 : index
    %0 = vector.load %arg1[%c0, %c0_0] : memref<8x32xf32, #tpu.memory_space<vmem>>, vector<8x32xf32>
    %c0_1 = arith.constant 0 : index
    %c0_2 = arith.constant 0 : index
    %1 = vector.load %arg2[%c0_1, %c0_2] : memref<32x128xf32, #tpu.memory_space<vmem>>, vector<32x128xf32>
    %cst = arith.constant dense<0.000000e+00> : vector<8x128xf32>
    %2 = tpu.matmul %0, %1, %cst {dimension_numbers = #tpu.dot_dimension_numbers<[1], [0], [0], [1], [0, 0, 1, 1], [], []>} : vector<8x32xf32>, vector<32x128xf32>, vector<8x128xf32> -> vector<8x128xf32>
    %c0_3 = arith.constant 0 : index
    %c0_4 = arith.constant 0 : index
    %3 = vector.load %arg3[%c0_3, %c0_4] : memref<1x128xf32, #tpu.memory_space<vmem>>, vector<1x128xf32>
    %4 = vector.broadcast %3 : vector<1x128xf32> to vector<8x128xf32>
    %5 = arith.addf %2, %4 : vector<8x128xf32>
    %c0_5 = arith.constant 0 : index
    %c0_6 = arith.constant 0 : index
    %6 = vector.load %arg4[%c0_5, %c0_6] : memref<8x128xf32, #tpu.memory_space<vmem>>, vector<8x128xf32>
    tpu.vector_store %arg4[%c0_5, %c0_6], %5 {strides = array<i32>} : memref<8x128xf32, #tpu.memory_space<vmem>>, vector<8x128xf32>,
    return
  }
  func.func @transform_0(%arg0: i32) -> (i32, i32) {
    %c0_i32 = arith.constant 0 : i32
    %c0_i32_0 = arith.constant 0 : i32
    return %arg0, %c0_i32 : i32, i32
  }
  func.func @transform_1(%arg0: i32) -> (i32, i32) {
    %c0_i32 = arith.constant 0 : i32
    %c0_i32_0 = arith.constant 0 : i32
    %c0_i32_1 = arith.constant 0 : i32
    return %c0_i32, %c0_i32_0 : i32, i32
  }
  func.func @transform_2(%arg0: i32) -> (i32, i32) {
    %c0_i32 = arith.constant 0 : i32
    %c0_i32_0 = arith.constant 0 : i32
    %c0_i32_1 = arith.constant 0 : i32
    return %c0_i32, %c0_i32_0 : i32, i32
  }
  func.func @transform_3(%arg0: i32) -> (i32, i32) {
    %c0_i32 = arith.constant 0 : i32
    %c0_i32_0 = arith.constant 0 : i32
    return %arg0, %c0_i32 : i32, i32
  }
}

</mosaic_0001>

<bundles_post_ra>
// kernel: tpu_custom_call.1
= control target key start
LH: loop header
LB: loop body
LE: loop exit
PB: predicated region body
PF: predicated region fallthrough
CT: control target
= control target key end

     0   :  { %8 = vsyncpa [#allocation3], 0  ;;  %s830_s0 = inlined_call_operand.hbm [shape: f32[20,32], index: 0, kind: input, shape index: {}]   ;;  %s831_s1 = inlined_call_operand.hbm [shape: f32[32,128], index: 1, kind: input, shape index: {}]   ;;  %s832_s2 = inlined_call_operand.vmem [shape: f32[1,128], index: 2, kind: input, shape index: {}]   ;;  %s833_s3 = inlined_call_operand.hbm [shape: f32[20,128], index: 3, kind: output, shape index: {}]  }
   0x1   :  { %10 = vsyncpa [#allocation3 + $0x1], 0 }
   0x2   :  { %11 = vsyncpa [#allocation6], 0 }
   0x3   :  { %12 = vsyncpa [#allocation4], 0 }
   0x4   :  { %14 = vsyncpa [#allocation4 + $0x1], 0  ;;  %s640_s12 = smov 0   ;;  %s642_s13 = smov 0  }
   0x5   :  { %s644_s14 = smov 0   ;;  %s646_s15 = smov 0  }
   0x6 LB: > { %s661_s16 = sadd.s32 4294967295, %s610_s15   ;;  %s382_s17 = sadd.s32 4294967294, %s610_s15   ;;  %s610_s15 = sphi %s646_s15, %s852_s15   ;;  %s606_s14 = sphi %s644_s14, %s851_s14   ;;  %s602_s13 = sphi %s642_s13, %s850_s13   ;;  %s598_s12 = sphi %s640_s12, %s849_s12  }
   0x7   : > { %p40_p0 = scmp.ne.s32.totalorder %s602_s13, %s598_s12  ;;  %p834_p1 = scmp.eq.s32.totalorder %s661_s16, 0 }
   0x8   : > { %p112_p3 = scmp.eq.s32.totalorder %s382_s17, 2  ;;  %p383_p5 = scmp.ge.s32.totalorder %s610_s15, 1 }
   0x9   : > { %p670_p4 = por %p834_p1, %p40_p0  ;;  %p119_p7 = scmp.lt.s32.totalorder %s610_s15, 4 }
   0xa   : > { %p675_p6 = por %p112_p3, %p40_p0  ;;  %s612_s21 = smov [#allocation5]  }
   0xb   : > { %s837_s18 = scalar_select %p670_p4, 1, 0 }
   0xc   : > { %s838_s19 = scalar_select %p675_p6, 1, 0 }
   0xd   : > { %p680_p8 = pnand %p383_p5, %p119_p7  ;;  %s131_s22 = sshll.u32 %s612_s21, 4  ;;  %s132_s22 = int_to_ptr.vmem [resolvable:$true] %s131_s22 }
   0xe   : > { %s693_s24 = sadd.s32 1, %s610_s15   ;;  %s27_s25 = sadd.s32 1, %s606_s14 }
   0xf   : > { %s839_s20 = scalar_select %p680_p8, 1, 0 }
  0x10   : > { %p428_p9 = pneg %p680_p8  ;;  %s24_s26 = ssub.s32 %s610_s15, %s693_s24 }
  0x11   : > { %s482_s29 = scalar_lea.hbm %s831_s1, 512 }
  0x12   : > { %p688_p10 = pnand %p428_p9, %p834_p1  ;;  %p483_p11 = scmp.ne.s32.totalorder %s831_s1, %s482_s29 }
  0x13   : > { %p489_p3 = scmp.lt.u32.totalorder %s482_s29, %s831_s1 }
  0x14   : > { %p484_p12 = pneg %p688_p10 }
  0x16   : > { %p485_p13 = pnand %p484_p12, %p483_p11 }
  0x18   : > { %p486_p0 = pneg %p485_p13 }
  0x1a   : > { %p491_p5 = pnand %p489_p3, %p486_p0 }
  0x1c   : > { %494 = shalt.err (!%p491_p5)
}
  0x1d   : > { %s495_s7 = scalar_lea.vmem %s132_s22, 512  ;;  %p503_p2 = scmp.lt.s32.totalorder %s132_s22, %s132_s22 }
  0x1e   : > { %p496_p7 = scmp.ne.s32.totalorder %s132_s22, %s495_s7  ;;  %p504_p6 = scmp.lt.s32.totalorder %s495_s7, %s495_s7 }
  0x20   : > { %p498_p9 = pnand %p496_p7, %p484_p12  ;;  %p505_p4 = por %p504_p6, %p503_p2 }
  0x22   : > { %p499_p1 = pneg %p498_p9 }
  0x24   : > { %p506_p8 = pnand %p505_p4, %p499_p1 }
  0x26   : > { %509 = shalt.err (!%p506_p8)
}
  0x27   : > { %s613_s8 = smov 128   ;;  %s614_s9 = smov 8  }
  0x28   : > { %431 = dma.hbm_to_vmem [thread:$0]  (!%p688_p10), %s831_s1, 512, %s132_s22, [#allocation6], %s613_s8, %s613_s8, %s614_s9  }
  0x29   : > { %p25_p11 = scmp.eq.s32.totalorder %s24_s26, 0  ;;  %p34_p2 = scmp.ne.s32.totalorder %s606_s14, %s602_s13 }
  0x2a   : > { %p35_p1 = scmp.eq.s32.totalorder %s610_s15, 0  ;;  %p441_p4 = scmp.lt.s32.totalorder %s610_s15, 3 }
  0x2b   : > { %s719_s17 = scalar_select %p25_p11, %s606_s14, %s27_s25  }
  0x2c   : > { %p36_p6 = por %p35_p1, %p34_p2  ;;  %p841_p8 = scmp.eq.s32.totalorder %s661_s16, 2 }
  0x2d   : > { %s148_s27 = sand.u32 1, %s606_s14   ;;  %s387_s28 = sshll.u32 %s610_s15, 7 }
  0x2e   : > { %p723_p12 = por %p841_p8, %p34_p2  ;;  %s386_s29 = sshll.u32 %s148_s27, 3 }
  0x2f   : > { %s732_s4 = scalar_lea.hbm %s830_s0, %s387_s28  ;;  %s152_s22 = scalar_lea.vmem [#allocation2], %s386_s29 }
  0x30   : > { %s159_s25 = sshll.u32 %s152_s22, 4  ;;  %p734_p10 = pnand %p441_p4, %p36_p6  ;;  %s738_s25 = int_to_ptr.vmem [resolvable:$true] %s159_s25 }
  0x31   : > { %s149_s5 = scalar_lea.sflag [#allocation3], %s148_s27  ;;  %s510_s6 = scalar_lea.hbm %s732_s4, 128 }
  0x32   : > { %p511_p13 = scmp.ne.s32.totalorder %s732_s4, %s510_s6  ;;  %p512_p0 = pneg %p734_p10 }
  0x33   : > { %s515_s9 = scalar_lea.hbm %s830_s0, 384  ;;  %p516_p7 = scmp.lt.u32.totalorder %s732_s4, %s830_s0 }
  0x34   : > { %p513_p3 = pnand %p512_p0, %p511_p13  ;;  %p517_p9 = scmp.lt.u32.totalorder %s515_s9, %s510_s6 }
  0x35   : > { %p519_p2 = scmp.lt.u32.totalorder %s510_s6, %s732_s4 }
  0x36   : > { %p514_p5 = pneg %p513_p3  ;;  %p518_p11 = por %p517_p9, %p516_p7 }
  0x38   : > { %p520_p1 = por %p519_p2, %p518_p11 }
  0x3a   : > { %p521_p4 = pnand %p520_p1, %p514_p5 }
  0x3c   : > { %524 = shalt.err (!%p521_p4)
}
  0x3d   : > { %s525_s27 = scalar_lea.vmem %s738_s25, 128  ;;  %s615_s28 = smov [#allocation2]  }
  0x3e   : > { %p526_p6 = scmp.ne.s32.totalorder %s738_s25, %s525_s27  ;;  %s530_s29 = sshll.u32 %s615_s28, 4  ;;  %s531_s29 = int_to_ptr.vmem [resolvable:$false] %s530_s29 }
  0x3f   : > { %s532_s23 = scalar_lea.vmem %s531_s29, 256  ;;  %p533_p3 = scmp.lt.s32.totalorder %s738_s25, %s531_s29 }
  0x40   : > { %p528_p8 = pnand %p526_p6, %p512_p0  ;;  %p534_p7 = scmp.lt.s32.totalorder %s532_s23, %s525_s27 }
  0x42   : > { %p529_p13 = pneg %p528_p8  ;;  %p535_p9 = por %p534_p7, %p533_p3 }
  0x44   : > { %p536_p11 = pnand %p535_p9, %p529_p13 }
  0x46   : > { %539 = shalt.err (!%p536_p11)
}
  0x47   : > { %435 = dma.hbm_to_vmem [thread:$0]  (!%p734_p10), %s732_s4, 128, %s738_s25, %s149_s5  }
  0x48   : > { %p844_p5 = scmp.ne.s32.totalorder %s839_s20, 0 }
  0x49   : > { %s768_s30 = sand.u32 (!%p844_p5), 1, %s602_s13   ;;  %p845_p0 = scmp.ne.s32.totalorder (!%p844_p5), %s837_s18, 0 }
  0x4a   : > { %168 = sbr.rel (%p844_p5) target bundleno = 323 (0x143), region = 32  ;;  %s389_s22 = sshll.u32 (!%p844_p5), %s768_s30, 3 }
  0x4b   : > { %s171_s6 = scalar_lea.sflag (!%p844_p5), [#allocation3], %s768_s30  ;;  %s174_s7 = scalar_lea.vmem (!%p844_p5), [#allocation2], %s389_s22 }
  0x51   : > { %585 = dma.done.wait (%p845_p0), %s171_s6, 128  }
  0x52   : > { %587 = vsyncadd (%p845_p0), %s171_s6, 4294967168  ;;  %p846_p2 = scmp.eq.s32.totalorder %s661_s16, 0 }
  0x54   : > { %589 = dma.done.wait (%p846_p2), [#allocation6], 512   ;;  %p847_p10 = pmov %p846_p2 }
  0x55   : > { %v616_v0 = vmov 0.0|0.0   ;;  %vm617_vm0 = vmmov 0   ;;  %v618_v1 = vmov 0.0   ;;  %v202_v2 = vld [vmem:[#allocation5] sm:$0xff]  ;;  %v203_v3 = vld [vmem:[#allocation5 + $0x8] sm:$0xff]  ;;  %v204_v4 = vld [vmem:[#allocation5 + $0x10] sm:$0xff] }
  0x56   : > { %591 = vsyncadd (%p847_p10), [#allocation6], 4294966784  ;;  %414 = vmatprep.subr.bf16.mxu0 %v616_v0  ;;  %411 = vmatprep.mubr.msk.f32.mxu0 %vm617_vm0, %v618_v1  ;;  %v415_v5 = vpack.c.bf16 %v203_v3, %v202_v2  ;;  %v205_v6 = vld [vmem:[#allocation5 + $0x18] sm:$0xff]  ;;  %vm213_vm1 = vcmask 261120   ;;  %v392_v9 = vld [vmem:[%s832_s2] ss:$0 sm:$0xff] }
  0x57   : > { %v418_v7 = vpack.c.bf16 %v205_v6, %v204_v4  ;;  %v201_v8 = vld [vmem:[%s174_s7] sm:$0xff]  ;;  %s395_s4 = sshll.u32 %s661_s16, 7  ;;  %s200_s25 = scalar_lea.vmem [#allocation7], %s389_s22 }
  0x58   : > { %416 = vmatpush3.bf16.msra.mxu0 %v415_v5  ;;  %s302_s26 = sshll.u32 %s200_s25, 4  ;;  %s787_s9 = scalar_lea.hbm %s833_s3, %s395_s4  ;;  %s789_s26 = int_to_ptr.vmem [resolvable:$true] %s302_s26 }
  0x59   : > { %417 = vmatprep.subr.bf16.mxu0 %v616_v0  ;;  %s289_s10 = scalar_lea.sflag [#allocation4], %s768_s30  ;;  %s540_s11 = scalar_lea.vmem %s789_s26, 128 }
  0x5a   : > { %p541_p1 = scmp.ne.s32.totalorder %s789_s26, %s540_s11  ;;  %s619_s16 = smov [#allocation7]  }
  0x5b   : > { %s544_s27 = sshll.u32 %s619_s16, 4  ;;  %s545_s27 = int_to_ptr.vmem [resolvable:$false] %s544_s27 }
  0x5c   : > { %419 = vmatpush3.bf16.msra.mxu0 %v418_v7  ;;  %p542_p4 = pnand %p541_p1, %p723_p12  ;;  %s546_s28 = scalar_lea.vmem %s545_s27, 256 }
  0x5d   : > { %p547_p8 = scmp.lt.s32.totalorder %s789_s26, %s545_s27  ;;  %p548_p13 = scmp.lt.s32.totalorder %s546_s28, %s540_s11 }
  0x5e   : > { %p543_p6 = pneg %p542_p4 }
  0x5f   : > { %412 = vmatmul.mubr.msk.f32.vlgmr.msra.gmra.mrb[0].mxu0 %vm213_vm1, %v201_v8  ;;  %p549_p3 = por %p548_p13, %p547_p8 }
  0x61   : > { %p550_p7 = pnand %p549_p3, %p543_p6 }
 0x132   : > { %v283_v10 = vpop.f32.mrb[0].mxu0 }
 0x133   : > { %v284_v11 = vadd.f32 %v392_v9, %v283_v10  ;;  %v413_v12 = vpop.f32.mrb[1].mxu0 }
 0x135   : > { %287 = vst [vmem:[%s200_s25] sm:$0xff] %v284_v11 }
 0x136   : > { %553 = shalt.err (!%p550_p7)
}
 0x137   : > { %s554_s29 = scalar_lea.hbm %s787_s9, 128  ;;  %s558_s22 = scalar_lea.hbm %s833_s3, 384 }
 0x138   : > { %p555_p9 = scmp.ne.s32.totalorder %s787_s9, %s554_s29  ;;  %p559_p0 = scmp.lt.u32.totalorder %s787_s9, %s833_s3 }
 0x139   : > { %p560_p2 = scmp.lt.u32.totalorder %s558_s22, %s554_s29  ;;  %p562_p1 = scmp.lt.u32.totalorder %s554_s29, %s787_s9 }
 0x13a   : > { %p556_p11 = pnand %p555_p9, %p723_p12 }
 0x13b   : > { %p561_p10 = por %p560_p2, %p559_p0 }
 0x13c   : > { %p557_p5 = pneg %p556_p11 }
 0x13d   : > { %p563_p4 = por %p562_p1, %p561_p10 }
 0x13f   : > { %p564_p6 = pnand %p563_p4, %p557_p5 }
 0x141   : > { %567 = shalt.err (!%p564_p6)
}
 0x142   : > { %426 = dma.vmem_to_hbm [thread:$0]  (%p723_p12), %s789_s26, 128, %s787_s9, %s289_s10  }
 0x143 PF: > { %p443_p8 = scmp.ge.s32.totalorder %s610_s15, 2  ;;  %s314_s18 = sand.u32 1, %s598_s12  }
 0x144   : > { %p848_p13 = scmp.ne.s32.totalorder %s838_s19, 0  ;;  %s315_s20 = scalar_lea.sflag [#allocation4], %s314_s18 }
 0x146   : > { %p437_p3 = pnand %p443_p8, %p848_p13 }
 0x148   : > { %593 = dma.done.wait (!%p437_p3), %s315_s20, 128  }
 0x149   : > { %595 = vsyncadd (!%p437_p3), %s315_s20, 4294967168  ;;  %p17_p7 = scmp.ge.s32.totalorder %s693_s24, 5   ;;  %s849_s12 = smov %s602_s13 }
 0x14a   : > { %s850_s13 = smov %s606_s14  ;;  %s851_s14 = smov %s719_s17 }
 0x14b   : > { %s852_s15 = smov %s693_s24  ;;  %19 = sbr.rel (!%p17_p7) target bundleno = 6 (0x6), region = 81 }
 0x152   :  { %320 = vsyncpa [#allocation3], 1 }
 0x153   :  { %322 = vsyncpa [#allocation3 + $0x1], 1 }
 0x154   :  { %323 = vsyncpa [#allocation6], 1 }
 0x155   :  { %324 = vsyncpa [#allocation4], 1 }
 0x156   :  { %326 = vsyncpa [#allocation4 + $0x1], 1 }

</bundles_post_ra>
